<compile_context>
chip_gen: v5e
topology: v5e:2x2
jax: 0.10.0
libtpu: 0.0.40
codegen_flags: <defaults>
</compile_context>

<pallas_src>
import functools

import jax
import jax.numpy as jnp
from jax.experimental import pallas as pl
from jax.experimental.pallas import tpu as pltpu

LEAKY_SLOPE = 0.1            # nn.LeakyReLU(0.1) in the reference UnaryBlock
GN_EPS = 1e-5                # nn.GroupNorm default eps
MXU_DTYPE = jnp.bfloat16     # MXU operand / activation-carry dtype (f32 accumulation)
MAX_TILE_ROWS = 512          # point-tile for the decoder linears (review: 512-1024)
ROW_ALIGN = 16               # sublane alignment for bf16 tiles
DESC_DIM = 32                # descriptor channels of decoder1
FAC_DIM = 2                  # overlapping / matching factor channels of decoder1
VMEM_LIMIT_BYTES = 48 * 1024 * 1024   # > v5e's 16 MiB scoped default, < v7x's 64 MiB physical


def _round_up(x, m):
    return (x + m - 1) // m * m


def _row_tiling(n, max_tile=MAX_TILE_ROWS):
    """Pick a 16-aligned row tile and padded row count for an (N, C) array."""
    na = _round_up(n, ROW_ALIGN)
    tn = min(max_tile, na)
    return tn, _round_up(na, tn)


def _pad_rows(x, npad):
    n = x.shape[0]
    return x if npad == n else jnp.pad(x, ((0, npad - n), (0, 0)))


def _vmem_specs(n):
    return [pl.BlockSpec(memory_space=pltpu.MemorySpace.VMEM) for _ in range(n)]


# ------------------------------ Pallas kernels ------------------------------

def _matching_kernel(ref_ref, srct_ref, wo_ref, bo_ref,
                     oref_ref, osrc_ref, mref_ref, msrc_ref):
    """Fused overlap score + normalized matching scores + m_ mat-vecs.

    ref_ref  : (Nr, D) coarse ref features (f32)
    srct_ref : (D, Ns) coarse src features, pre-transposed in the wrapper (f32)
    wo_ref   : (1, D), bo_ref : (1, 1)  -- overlap_score Linear
    outputs  : o_ref (Nr,1), o_src_row (1,Ns), m_ref (Nr,1), m_src_row (1,Ns)
    """
    rf = ref_ref[...]
    sft = srct_ref[...]
    wo = wo_ref[...]
    bo = bo_ref[...]

    # overlap scores as lane / sublane reduces (no width-1 MXU matmuls)
    o_r = jnp.sum(rf * wo, axis=1, keepdims=True) + bo                     # (Nr, 1)
    o_s = jnp.dot(wo, sft, preferred_element_type=jnp.float32) + bo        # (1, Ns)
    oref_ref[...] = o_r
    osrc_ref[...] = o_s

    # F.normalize(p=2, dim=1, eps=1e-12)
    rn = rf / jnp.maximum(jnp.sqrt(jnp.sum(rf * rf, axis=1, keepdims=True)), 1e-12)
    snt = sft / jnp.maximum(jnp.sqrt(jnp.sum(sft * sft, axis=0, keepdims=True)), 1e-12)

    # similarity kept in f32: 2 - 2*xy amplifies bf16 rounding when xy ~ 1
    xy = jnp.dot(rn, snt, preferred_element_type=jnp.float32)              # (Nr, Ns)
    # exp(-clamp(2 - 2*xy, min=0)) == exp(min(2*xy - 2, 0))
    ms = jnp.exp(jnp.minimum(2.0 * xy - 2.0, 0.0))
    # (ms/rsum)*(ms/csum) == ms^2 * (1/rsum) * (1/csum); reciprocals on the EUP slot
    rinv = pl.reciprocal(jnp.sum(ms, axis=1, keepdims=True), approx=True)  # (Nr, 1)
    cinv = pl.reciprocal(jnp.sum(ms, axis=0, keepdims=True), approx=True)  # (1, Ns)
    w = (ms * ms) * rinv * cinv

    mref_ref[...] = jnp.sum(w * o_s, axis=1, keepdims=True)                # w  @ o_src
    msrc_ref[...] = jnp.sum(w * o_r, axis=0, keepdims=True)                # (w.T @ o_ref).T


def _unary_block_kernel(xa_ref, xb_ref, wa_ref, wb_ref, b_ref, gmat_ref, gamma_ref, beta_ref,
                        out_ref, h_scr, sum_scr, sq_scr, scale_scr, shift_scr,
                        *, n_valid, tile_n, n_tiles, inv_count):
    """Fused UnaryBlock: Linear + GroupNorm + LeakyReLU in one pallas_call.

    grid = (2, n_tiles), both axes "arbitrary" (sequential):
      pass 0: h = xa@Wa + xb@Wb + b  -> persistent VMEM scratch; masked channel stats
              accumulated in VMEM; scale/shift finalized in-kernel at the last tile.
      pass 1: out = LeakyReLU(h * scale + shift), read from VMEM (no HBM round-trip of h).
    """
    p = pl.program_id(0)
    i = pl.program_id(1)

    @pl.when(p == 0)
    def _pass0():
        h = (jnp.dot(xa_ref[...].astype(MXU_DTYPE), wa_ref[...],
                     preferred_element_type=jnp.float32)
             + jnp.dot(xb_ref[...].astype(MXU_DTYPE), wb_ref[...],
                       preferred_element_type=jnp.float32)
             + b_ref[...])
        h_scr[i] = h

        # rows >= n_valid are padding -> must not contribute to GroupNorm statistics
        row = i * tile_n + jax.lax.broadcasted_iota(jnp.int32, (tile_n, 1), 0)
        hm = jnp.where(row < n_valid, h, 0.0)

        @pl.when(i == 0)
        def _init():
            sum_scr[...] = jnp.zeros_like(sum_scr)
            sq_scr[...] = jnp.zeros_like(sq_scr)

        sum_scr[...] += jnp.sum(hm, axis=0, keepdims=True)          # (1, C) channel sums
        sq_scr[...] += jnp.sum(hm * hm, axis=0, keepdims=True)      # (1, C) channel sum-sqs

        @pl.when(i == n_tiles - 1)
        def _finalize():
            # group sums broadcast back per-channel via a (C, C) group-membership matmul
            gsum = jnp.dot(sum_scr[...], gmat_ref[...], preferred_element_type=jnp.float32)
            gsq = jnp.dot(sq_scr[...], gmat_ref[...], preferred_element_type=jnp.float32)
            mean = gsum * inv_count
            # single-pass variance; clamp at 0 to guard against cancellation
            var = jnp.maximum(gsq * inv_count - mean * mean, 0.0)
            scale = gamma_ref[...] * jax.lax.rsqrt(var + GN_EPS)
            scale_scr[...] = scale
            shift_scr[...] = beta_ref[...] - mean * scale

    @pl.when(p == 1)
    def _pass1():
        y = h_scr[i] * scale_scr[...] + shift_scr[...]
        out_ref[...] = jnp.where(y >= 0.0, y, LEAKY_SLOPE * y).astype(out_ref.dtype)


def _last_unary_kernel(xa_ref, xb_ref, wda_ref, wdb_ref, bd_ref, wfa_ref, wfb_ref, bf_ref,
                       desc_ref, fac_ref):
    """LastUnaryBlock: Linear, emitting the consumer layout directly.

    desc_ref : (tn, 32) descriptor columns (no activation)
    fac_ref  : (tn, 2)  overlapping / matching factor columns with sigmoid fused in
                        (sigmoid only on these 2 lanes, not a padded 128-lane tile).
    """
    xa = xa_ref[...].astype(MXU_DTYPE)
    xb = xb_ref[...].astype(MXU_DTYPE)
    desc = (jnp.dot(xa, wda_ref[...], preferred_element_type=jnp.float32)
            + jnp.dot(xb, wdb_ref[...], preferred_element_type=jnp.float32)
            + bd_ref[...])
    fac = (jnp.dot(xa, wfa_ref[...], preferred_element_type=jnp.float32)
           + jnp.dot(xb, wfb_ref[...], preferred_element_type=jnp.float32)
           + bf_ref[...])
    desc_ref[...] = desc
    fac_ref[...] = 1.0 / (1.0 + jnp.exp(-fac))


# ------------------------------- wrappers -----------------------------------

def matching_apply(overlap_p, ref_feats, src_feats):
    """Coarse matching: overlap Linear + matching scores + m_ (single fused kernel).

    Whole-array VMEM blocks: the coarse level is small (superpoints), so the (Nr, Ns)
    matrix fits comfortably in VMEM and never round-trips through HBM.
    """
    nr, d = ref_feats.shape
    ns = src_feats.shape[0]
    src_t = src_feats.T                         # (D, Ns): no in-kernel transpose needed
    wo_row = overlap_p['W'].T                   # (1, D)
    o_r, o_s_row, m_r, m_s_row = pl.pallas_call(
        _matching_kernel,
        out_shape=(jax.ShapeDtypeStruct((nr, 1), jnp.float32),
                   jax.ShapeDtypeStruct((1, ns), jnp.float32),
                   jax.ShapeDtypeStruct((nr, 1), jnp.float32),
                   jax.ShapeDtypeStruct((1, ns), jnp.float32)),
        in_specs=_vmem_specs(4),
        out_specs=tuple(_vmem_specs(4)),
        compiler_params=pltpu.CompilerParams(vmem_limit_bytes=VMEM_LIMIT_BYTES),
    )(ref_feats, src_t, wo_row, overlap_p['b'])
    return o_r, o_s_row.reshape(ns, 1), m_r, m_s_row.reshape(ns, 1)


def unary_block_apply(p, x_a, x_b):
    """UnaryBlock on two un-concatenated halves: Linear + GroupNorm + LeakyReLU(0.1).

    Equivalent to Linear(concat([x_a, x_b], axis=1)) with W split row-wise; the concat
    copy never exists.  Output is carried in bf16 (it only feeds the next level's MXU).
    """
    W, b, gamma, beta, groups = p['W'], p['b'], p['gamma'], p['beta'], p['groups']
    n, cin_a = x_a.shape
    cin_b = x_b.shape[1]
    cout = W.shape[1]
    wa = W[:cin_a].astype(MXU_DTYPE)            # pre-cast once in the wrapper
    wb = W[cin_a:].astype(MXU_DTYPE)

    tn, npad = _row_tiling(n)
    n_tiles = npad // tn
    xa = _pad_rows(x_a, npad)
    xb = _pad_rows(x_b, npad)

    cpg = cout // groups
    gidx = jnp.arange(cout, dtype=jnp.int32) // cpg
    gmat = (gidx[:, None] == gidx[None, :]).astype(jnp.float32)     # (C, C) group membership

    kern = functools.partial(_unary_block_kernel, n_valid=n, tile_n=tn,
                             n_tiles=n_tiles, inv_count=1.0 / float(n * cpg))
    out = pl.pallas_call(
        kern,
        out_shape=jax.ShapeDtypeStruct((npad, cout), MXU_DTYPE),
        grid=(2, n_tiles),
        in_specs=[
            # x tiles only needed in pass 0; pass 1 pins block 0 (no re-streaming from HBM)
            pl.BlockSpec((tn, cin_a), lambda p, i: ((1 - p) * i, 0)),
            pl.BlockSpec((tn, cin_b), lambda p, i: ((1 - p) * i, 0)),
            pl.BlockSpec((cin_a, cout), lambda p, i: (0, 0)),
            pl.BlockSpec((cin_b, cout), lambda p, i: (0, 0)),
            pl.BlockSpec((1, cout), lambda p, i: (0, 0)),
            pl.BlockSpec((cout, cout), lambda p, i: (0, 0)),
            pl.BlockSpec((1, cout), lambda p, i: (0, 0)),
            pl.BlockSpec((1, cout), lambda p, i: (0, 0)),
        ],
        # pass 0 maps to a constant block (never flushed with garbage); pass 1 writes tile i
        out_specs=pl.BlockSpec((tn, cout), lambda p, i: (p * i, 0)),
        scratch_shapes=[
            pltpu.VMEM((n_tiles, tn, cout), jnp.float32),   # h, VMEM-resident across passes
            pltpu.VMEM((1, cout), jnp.float32),             # channel sums
            pltpu.VMEM((1, cout), jnp.float32),             # channel sum-squares
            pltpu.VMEM((1, cout), jnp.float32),             # GroupNorm scale
            pltpu.VMEM((1, cout), jnp.float32),             # GroupNorm shift
        ],
        # both axes sequential: global GN stats + h scratch are carried across tiles
        # (TODO(synk): v7x megacore would need per-core partial stats + a cross-core reduce)
        compiler_params=pltpu.CompilerParams(
            dimension_semantics=("arbitrary", "arbitrary"),
            vmem_limit_bytes=VMEM_LIMIT_BYTES),
    )(xa, xb, wa, wb, b, gmat, gamma, beta)
    return out[:n]


def last_unary_block_apply(p, x_a, x_b):
    """LastUnaryBlock on two halves: Linear only, split into descriptor / factor outputs."""
    W, b = p['W'], p['b']
    n, cin_a = x_a.shape
    cin_b = x_b.shape[1]
    wd, wf = W[:, :DESC_DIM], W[:, DESC_DIM:DESC_DIM + FAC_DIM]
    wda = wd[:cin_a].astype(MXU_DTYPE)
    wdb = wd[cin_a:].astype(MXU_DTYPE)
    wfa = wf[:cin_a].astype(MXU_DTYPE)
    wfb = wf[cin_a:].astype(MXU_DTYPE)
    bd, bf = b[:, :DESC_DIM], b[:, DESC_DIM:DESC_DIM + FAC_DIM]

    tn, npad = _row_tiling(n)
    n_tiles = npad // tn
    xa = _pad_rows(x_a, npad)
    xb = _pad_rows(x_b, npad)

    desc, fac = pl.pallas_call(
        _last_unary_kernel,
        out_shape=(jax.ShapeDtypeStruct((npad, DESC_DIM), jnp.float32),
                   jax.ShapeDtypeStruct((npad, FAC_DIM), jnp.float32)),
        grid=(n_tiles,),
        in_specs=[pl.BlockSpec((tn, cin_a), lambda i: (i, 0)),
                  pl.BlockSpec((tn, cin_b), lambda i: (i, 0)),
                  pl.BlockSpec((cin_a, DESC_DIM), lambda i: (0, 0)),
                  pl.BlockSpec((cin_b, DESC_DIM), lambda i: (0, 0)),
                  pl.BlockSpec((1, DESC_DIM), lambda i: (0, 0)),
                  pl.BlockSpec((cin_a, FAC_DIM), lambda i: (0, 0)),
                  pl.BlockSpec((cin_b, FAC_DIM), lambda i: (0, 0)),
                  pl.BlockSpec((1, FAC_DIM), lambda i: (0, 0))],
        out_specs=(pl.BlockSpec((tn, DESC_DIM), lambda i: (i, 0)),
                   pl.BlockSpec((tn, FAC_DIM), lambda i: (i, 0))),
        compiler_params=pltpu.CompilerParams(
            dimension_semantics=("parallel",),
            vmem_limit_bytes=VMEM_LIMIT_BYTES),
    )(xa, xb, wda, wdb, bd, wfa, wfb, bf)
    return desc[:n], fac[:n]


def nearest_upsample(x, upsample_indices):
    # gather-only op (closest neighbor; shadow index -> zero row); stays in JAX glue
    x_pad = jnp.concatenate([x, jnp.zeros((1, x.shape[1]), x.dtype)], axis=0)
    return x_pad[upsample_indices[:, 0]]


# ----------------------------- parameter init -------------------------------

def make_linear_params(key, cin, cout):
    k1, k2 = jax.random.split(key)
    w = jax.random.normal(k1, (cin, cout), jnp.float32) / jnp.sqrt(float(cin))
    b = jax.random.normal(k2, (1, cout), jnp.float32) * 0.01
    return dict(W=w, b=b)


def make_unary_params(key, cin, cout, groups):
    p = make_linear_params(key, cin, cout)
    p.update(gamma=jnp.ones((1, cout), jnp.float32),
             beta=jnp.zeros((1, cout), jnp.float32),
             groups=groups)
    return p


def make_desc_factor_params(key, output_dim, init_dim, group_norm):
    keys = jax.random.split(key, 4)
    return dict(
        decoder3=make_unary_params(keys[0], init_dim * 8 + output_dim + 2, init_dim * 2, group_norm),
        decoder2=make_unary_params(keys[1], init_dim * 2 + init_dim * 4, init_dim, group_norm),
        decoder1=make_linear_params(keys[2], init_dim + init_dim * 2, DESC_DIM + FAC_DIM),
        overlap_score=make_linear_params(keys[3], output_dim, 1),
    )


# ------------------------------ module forward ------------------------------

def glorn_desc_factor_forward(params, encoder_feats_list, ref_feats_c, src_feats_c, data_dict):
    feats_s1, feats_s2, feats_s3 = encoder_feats_list
    upsampling_list = data_dict['upsampling']
    # host-side scalar, like .item() in torch; keep this outside any jitted region
    ref_length = int(data_dict['lengths'][0][0])

    # coarse overlap scores + matching-weighted scores (single fused Pallas kernel)
    o_ref, o_src, m_ref, m_src = matching_apply(params['overlap_score'], ref_feats_c, src_feats_c)
    latent_s4 = jnp.concatenate(
        [jnp.concatenate([ref_feats_c, src_feats_c], axis=0),
         jnp.concatenate([o_ref, o_src], axis=0),
         jnp.concatenate([m_ref, m_src], axis=0)], axis=1).astype(MXU_DTYPE)  # tiny coarse concat

    # decoders: upsampled latent and encoder skip feats stay un-concatenated (split weights)
    latent_s3 = nearest_upsample(latent_s4, upsampling_list[2])
    latent_s3 = unary_block_apply(params['decoder3'], latent_s3, feats_s3)

    latent_s2 = nearest_upsample(latent_s3, upsampling_list[1])
    latent_s2 = unary_block_apply(params['decoder2'], latent_s2, feats_s2)

    latent_s1 = nearest_upsample(latent_s2, upsampling_list[0])
    descriptor, factors = last_unary_block_apply(params['decoder1'], latent_s1, feats_s1)

    overlapping_factor = factors[:, 0]        # sigmoid already fused into the kernel
    matching_factor = factors[:, 1]           # sigmoid already fused into the kernel

    ref_descriptors = descriptor[:ref_length]
    src_descriptors = descriptor[ref_length:]
    ref_overlapping_factor = overlapping_factor[:ref_length]
    src_overlapping_factor = overlapping_factor[ref_length:]
    ref_matching_factor = matching_factor[:ref_length]
    src_matching_factor = matching_factor[ref_length:]
    return (ref_descriptors, src_descriptors,
            ref_overlapping_factor, src_overlapping_factor,
            ref_matching_factor, src_matching_factor)


# ---------------------------------- main -------------------------------------

if __name__ == "__main__":
    key = jax.random.PRNGKey(0)
    output_dim, init_dim, group_norm = 32, 8, 4
    n1, n2, n3 = 32, 16, 8          # points per pyramid level (fine -> coarse)
    nr, ns = 6, 5                   # coarse ref / src superpoints
    n4 = nr + ns
    k_up = 3                        # neighbors per upsampling table
    ref_length = 20                 # ref points at the finest level

    keys = jax.random.split(key, 9)
    feats_s1 = jax.random.normal(keys[0], (n1, init_dim * 2), jnp.float32)
    feats_s2 = jax.random.normal(keys[1], (n2, init_dim * 4), jnp.float32)
    feats_s3 = jax.random.normal(keys[2], (n3, init_dim * 8), jnp.float32)
    ref_feats_c = jax.random.normal(keys[3], (nr, output_dim), jnp.float32)
    src_feats_c = jax.random.normal(keys[4], (ns, output_dim), jnp.float32)
    upsampling = [
        jax.random.randint(keys[5], (n1, k_up), 0, n2 + 1).astype(jnp.int32),  # level1 <- level2
        jax.random.randint(keys[6], (n2, k_up), 0, n3 + 1).astype(jnp.int32),  # level2 <- level3
        jax.random.randint(keys[7], (n3, k_up), 0, n4 + 1).astype(jnp.int32),  # level3 <- coarse
    ]
    lengths = [
        jnp.array([ref_length, n1 - ref_length], jnp.int32),
        jnp.array([10, 6], jnp.int32),
        jnp.array([5, 3], jnp.int32),
        jnp.array([nr, ns], jnp.int32),
    ]
    data_dict = dict(upsampling=upsampling, lengths=lengths)
    params = make_desc_factor_params(keys[8], output_dim, init_dim, group_norm)

    outs = jax.block_until_ready(
        glorn_desc_factor_forward(params, [feats_s1, feats_s2, feats_s3],
                                  ref_feats_c, src_feats_c, data_dict))
    (ref_desc, src_desc, ref_ov, src_ov, ref_mt, src_mt) = outs

    assert ref_desc.shape == (ref_length, DESC_DIM)
    assert src_desc.shape == (n1 - ref_length, DESC_DIM)
    assert ref_ov.shape == (ref_length,) and src_ov.shape == (n1 - ref_length,)
    assert ref_mt.shape == (ref_length,) and src_mt.shape == (n1 - ref_length,)
    assert bool(jnp.all((ref_ov >= 0.0) & (ref_ov <= 1.0)))
    assert bool(jnp.all((src_mt >= 0.0) & (src_mt <= 1.0)))
    print("KERNEL_OK")
</pallas_src>

<mosaic_0001>
module attributes {stable_mosaic.version = 11 : i64} {
  func.func @_matching_kernel(%arg0: memref<6x32xf32, #tpu.memory_space<vmem>>, %arg1: memref<32x5xf32, #tpu.memory_space<vmem>>, %arg2: memref<1x32xf32, #tpu.memory_space<vmem>>, %arg3: memref<1x1xf32, #tpu.memory_space<vmem>>, %arg4: memref<6x1xf32, #tpu.memory_space<vmem>>, %arg5: memref<1x5xf32, #tpu.memory_space<vmem>>, %arg6: memref<6x1xf32, #tpu.memory_space<vmem>>, %arg7: memref<1x5xf32, #tpu.memory_space<vmem>>) attributes {dimension_semantics = [], scalar_prefetch = 0 : i64, scratch_operands = 0 : i64, tpu.core_type = #tpu.core_type<tc>} {
    %c0 = arith.constant 0 : index
    %c0_0 = arith.constant 0 : index
    %0 = vector.load %arg0[%c0, %c0_0] : memref<6x32xf32, #tpu.memory_space<vmem>>, vector<6x32xf32>
    %c0_1 = arith.constant 0 : index
    %c0_2 = arith.constant 0 : index
    %1 = vector.load %arg1[%c0_1, %c0_2] : memref<32x5xf32, #tpu.memory_space<vmem>>, vector<32x5xf32>
    %c0_3 = arith.constant 0 : index
    %c0_4 = arith.constant 0 : index
    %2 = vector.load %arg2[%c0_3, %c0_4] : memref<1x32xf32, #tpu.memory_space<vmem>>, vector<1x32xf32>
    %c0_5 = arith.constant 0 : index
    %c0_6 = arith.constant 0 : index
    %3 = vector.load %arg3[%c0_5, %c0_6] : memref<1x1xf32, #tpu.memory_space<vmem>>, vector<1x1xf32>
    %4 = vector.broadcast %2 : vector<1x32xf32> to vector<6x32xf32>
    %5 = arith.mulf %0, %4 : vector<6x32xf32>
    %cst = arith.constant dense<0.000000e+00> : vector<6xf32>
    %6 = vector.multi_reduction <add>, %5, %cst [1] : vector<6x32xf32> to vector<6xf32>
    %7 = vector.shape_cast %6 : vector<6xf32> to vector<6x1xf32>
    %8 = vector.broadcast %3 : vector<1x1xf32> to vector<6x1xf32>
    %9 = arith.addf %7, %8 : vector<6x1xf32>
    %cst_7 = arith.constant dense<0.000000e+00> : vector<1x5xf32>
    %10 = tpu.matmul %2, %1, %cst_7 {dimension_numbers = #tpu.dot_dimension_numbers<[1], [0], [0], [1], [0, 0, 1, 1], [], []>} : vector<1x32xf32>, vector<32x5xf32>, vector<1x5xf32> -> vector<1x5xf32>
    %11 = vector.broadcast %3 : vector<1x1xf32> to vector<1x5xf32>
    %12 = arith.addf %10, %11 : vector<1x5xf32>
    %c0_8 = arith.constant 0 : index
    %c0_9 = arith.constant 0 : index
    %13 = vector.load %arg4[%c0_8, %c0_9] : memref<6x1xf32, #tpu.memory_space<vmem>>, vector<6x1xf32>
    tpu.vector_store %arg4[%c0_8, %c0_9], %9 {strides = array<i32>} : memref<6x1xf32, #tpu.memory_space<vmem>>, vector<6x1xf32>,
    %c0_10 = arith.constant 0 : index
    %c0_11 = arith.constant 0 : index
    %14 = vector.load %arg5[%c0_10, %c0_11] : memref<1x5xf32, #tpu.memory_space<vmem>>, vector<1x5xf32>
    tpu.vector_store %arg5[%c0_10, %c0_11], %12 {strides = array<i32>} : memref<1x5xf32, #tpu.memory_space<vmem>>, vector<1x5xf32>,
    %15 = arith.mulf %0, %0 : vector<6x32xf32>
    %cst_12 = arith.constant dense<0.000000e+00> : vector<6xf32>
    %16 = vector.multi_reduction <add>, %15, %cst_12 [1] : vector<6x32xf32> to vector<6xf32>
    %17 = vector.shape_cast %16 : vector<6xf32> to vector<6x1xf32>
    %18 = math.sqrt %17 : vector<6x1xf32>
    %cst_13 = arith.constant 9.99999996E-13 : f32
    %19 = vector.broadcast %cst_13 : f32 to vector<6x1xf32>
    %20 = arith.maximumf %18, %19 : vector<6x1xf32>
    %21 = vector.broadcast %20 : vector<6x1xf32> to vector<6x32xf32>
    %22 = arith.divf %0, %21 : vector<6x32xf32>
    %23 = arith.mulf %1, %1 : vector<32x5xf32>
    %cst_14 = arith.constant dense<0.000000e+00> : vector<5xf32>
    %24 = vector.multi_reduction <add>, %23, %cst_14 [0] : vector<32x5xf32> to vector<5xf32>
    %25 = vector.shape_cast %24 : vector<5xf32> to vector<1x5xf32>
    %26 = math.sqrt %25 : vector<1x5xf32>
    %cst_15 = arith.constant 9.99999996E-13 : f32
    %27 = vector.broadcast %cst_15 : f32 to vector<1x5xf32>
    %28 = arith.maximumf %26, %27 : vector<1x5xf32>
    %29 = vector.broadcast %28 : vector<1x5xf32> to vector<32x5xf32>
    %30 = arith.divf %1, %29 : vector<32x5xf32>
    %cst_16 = arith.constant dense<0.000000e+00> : vector<6x5xf32>
    %31 = tpu.matmul %22, %30, %cst_16 {dimension_numbers = #tpu.dot_dimension_numbers<[1], [0], [0], [1], [0, 0, 1, 1], [], []>} : vector<6x32xf32>, vector<32x5xf32>, vector<6x5xf32> -> vector<6x5xf32>
    %cst_17 = arith.constant 2.000000e+00 : f32
    %32 = vector.broadcast %cst_17 : f32 to vector<6x5xf32>
    %33 = arith.mulf %32, %31 : vector<6x5xf32>
    %cst_18 = arith.constant 2.000000e+00 : f32
    %34 = vector.broadcast %cst_18 : f32 to vector<6x5xf32>
    %35 = arith.subf %33, %34 : vector<6x5xf32>
    %cst_19 = arith.constant 0.000000e+00 : f32
    %36 = vector.broadcast %cst_19 : f32 to vector<6x5xf32>
    %37 = arith.minimumf %35, %36 : vector<6x5xf32>
    %38 = math.exp %37 : vector<6x5xf32>
    %cst_20 = arith.constant dense<0.000000e+00> : vector<6xf32>
    %39 = vector.multi_reduction <add>, %38, %cst_20 [1] : vector<6x5xf32> to vector<6xf32>
    %40 = vector.shape_cast %39 : vector<6xf32> to vector<6x1xf32>
    %41 = tpu.reciprocal %40 {approx = true} : vector<6x1xf32> -> vector<6x1xf32>
    %cst_21 = arith.constant dense<0.000000e+00> : vector<5xf32>
    %42 = vector.multi_reduction <add>, %38, %cst_21 [0] : vector<6x5xf32> to vector<5xf32>
    %43 = vector.shape_cast %42 : vector<5xf32> to vector<1x5xf32>
    %44 = tpu.reciprocal %43 {approx = true} : vector<1x5xf32> -> vector<1x5xf32>
    %45 = arith.mulf %38, %38 : vector<6x5xf32>
    %46 = vector.broadcast %41 : vector<6x1xf32> to vector<6x5xf32>
    %47 = arith.mulf %45, %46 : vector<6x5xf32>
    %48 = vector.broadcast %44 : vector<1x5xf32> to vector<6x5xf32>
    %49 = arith.mulf %47, %48 : vector<6x5xf32>
    %50 = vector.broadcast %12 : vector<1x5xf32> to vector<6x5xf32>
    %51 = arith.mulf %49, %50 : vector<6x5xf32>
    %cst_22 = arith.constant dense<0.000000e+00> : vector<6xf32>
    %52 = vector.multi_reduction <add>, %51, %cst_22 [1] : vector<6x5xf32> to vector<6xf32>
    %53 = vector.shape_cast %52 : vector<6xf32> to vector<6x1xf32>
    %c0_23 = arith.constant 0 : index
    %c0_24 = arith.constant 0 : index
    %54 = vector.load %arg6[%c0_23, %c0_24] : memref<6x1xf32, #tpu.memory_space<vmem>>, vector<6x1xf32>
    tpu.vector_store %arg6[%c0_23, %c0_24], %53 {strides = array<i32>} : memref<6x1xf32, #tpu.memory_space<vmem>>, vector<6x1xf32>,
    %55 = vector.broadcast %9 : vector<6x1xf32> to vector<6x5xf32>
    %56 = arith.mulf %49, %55 : vector<6x5xf32>
    %cst_25 = arith.constant dense<0.000000e+00> : vector<5xf32>
    %57 = vector.multi_reduction <add>, %56, %cst_25 [0] : vector<6x5xf32> to vector<5xf32>
    %58 = vector.shape_cast %57 : vector<5xf32> to vector<1x5xf32>
    %c0_26 = arith.constant 0 : index
    %c0_27 = arith.constant 0 : index
    %59 = vector.load %arg7[%c0_26, %c0_27] : memref<1x5xf32, #tpu.memory_space<vmem>>, vector<1x5xf32>
    tpu.vector_store %arg7[%c0_26, %c0_27], %58 {strides = array<i32>} : memref<1x5xf32, #tpu.memory_space<vmem>>, vector<1x5xf32>,
    return
  }
}

</mosaic_0001>

<bundles_post_ra>
// kernel: tpu_custom_call.1
= control target key start
LH: loop header
LB: loop body
LE: loop exit
PB: predicated region body
PF: predicated region fallthrough
CT: control target
= control target key end

     0   :  { %s437_s0 = inlined_call_operand.vmem [shape: f32[6,32], index: 0, kind: input, shape index: {}]   ;;  %s438_s1 = inlined_call_operand.vmem [shape: f32[32,5], index: 1, kind: input, shape index: {}]   ;;  %s439_s2 = inlined_call_operand.vmem [shape: f32[1,32], index: 2, kind: input, shape index: {}]   ;;  %s440_s3 = inlined_call_operand.<no memory space> [shape: f32[1,1], index: 3, kind: input, shape index: {}]   ;;  %s441_s4 = inlined_call_operand.vmem [shape: f32[6,1], index: 4, kind: output, shape index: {0}]   ;;  %s442_s5 = inlined_call_operand.hbm [shape: f32[1,5], index: 5, kind: output, shape index: {1}]   ;;  %s443_s6 = inlined_call_operand.vmem [shape: f32[6,1], index: 6, kind: output, shape index: {2}]   ;;  %s444_s7 = inlined_call_operand.hbm [shape: f32[1,5], index: 7, kind: output, shape index: {3}]  }
   0x1   :  { %v13_v0 = vstv %s440_s3 }
   0x2   :  { %14 = vst [vmem:[#allocation2] sm:$0x1] %v13_v0 }
   0x3   :  { %15 = vsyncpa [#allocation4], 0  ;;  %v386_v1 = vld [vmem:[%s437_s0] sm:$0x3f]  ;;  %vm36_vm0 = vcmask 259072  }
   0x4   :  { %16 = vsyncpa [#allocation6], 0  ;;  %v76_v2 = vmul.f32 %v386_v1, %v386_v1  ;;  %v394_v4 = vld [vmem:[%s438_s1] sm:$0xff]  ;;  %v27_v5 = vld [vmem:[%s438_s1 + $0x8] sm:$0xff]  ;;  %vm112_vm1 = vcmask 39936   ;;  %vm49_vm8 = vcmask 261120  }
   0x5   :  { %v108_v6 = vmul.f32 %v394_v4, %v394_v4  ;;  %v109_v7 = vmul.f32 %v27_v5, %v27_v5  ;;  %v28_v8 = vld [vmem:[%s438_s1 + $0x10] sm:$0xff]  ;;  %v29_v12 = vld [vmem:[%s438_s1 + $0x18] sm:$0xff]  ;;  %v30_v54 = vld [vmem:[%s439_s2] sm:$0x1]  ;;  %vm185_vm15 = vcmask 37888   ;;  %s242_s18 = sshll.u32 %s444_s7, 4  ;;  %s243_s18 = int_to_ptr.hbm [resolvable:$true] %s242_s18 }
   0x6   :  { %v77_v3 = vsel %vm36_vm0, %v76_v2, 0.0  ;;  %v110_v9 = vmul.f32 %v28_v8, %v28_v8  ;;  %v111_v14 = vmul.f32 %v29_v12, %v29_v12  ;;  %64 = vmatpush.msra.mxu0 %v29_v12  ;;  %v269_v55 = vld [vmem:[%s439_s2] ss:$0 sm:$0xff]  ;;  %s339_s19 = smov [#allocation3]   ;;  %s229_s23 = sshll.u32 %s442_s5, 4  ;;  %s230_s23 = int_to_ptr.hbm [resolvable:$true] %s229_s23 }
   0x7   :  { %78 = vadd.xlane.f32.xlu0 %v77_v3  ;;  %v113_v10 = vsel %vm112_vm1, %v108_v6, 0.0  ;;  %v114_v11 = vsel %vm112_vm1, %v109_v7, 0.0  ;;  %v35_v57 = vmul.f32 %v269_v55, %v386_v1  ;;  %s227_s20 = sshll.u32 %s339_s19, 4  ;;  %s228_s20 = int_to_ptr.vmem [resolvable:$true] %s227_s20 }
   0x8   :  { %v115_v13 = vadd.f32 %v114_v11, %v113_v10  ;;  %v116_v15 = vsel %vm112_vm1, %v110_v9, 0.0  ;;  %v118_v17 = vsel %vm112_vm1, %v111_v14, 0.0  ;;  %65 = vmatpush.msra.mxu0 %v28_v8  ;;  %v337_v14 = vmov 0  }
   0x9   :  { %v37_v59 = vsel %vm36_vm0, %v35_v57, 0.0  ;;  %266 = vset.pattern.permute.xlu1 %v337_v14  ;;  %267 = vset.pattern.permute.xlu2 %v337_v14  ;;  %vm72_vm0 = vcmask 5120   ;;  %vm74_vm1 = vcmask 32768  }
   0xa   :  { %v117_v16 = vadd.f32 %v116_v15, %v115_v13  ;;  %66 = vmatpush.msra.mxu0 %v27_v5  ;;  %268 = vset.pattern.permute.xlu0 %v337_v14 }
   0xc   :  { %v119_v18 = vadd.f32 %v118_v17, %v117_v16  ;;  %67 = vmatpush.msra.mxu0 %v394_v4 }
   0xd   :  { %260 = vmatmul.msk.f32.vlgmr.msra.gmra.mxu0 %vm49_vm8, %v30_v54 }
   0xe   :  { %v120_v19 = vrot.slane %v119_v18, 4 }
   0xf   :  { %38 = vadd.xlane.f32.xlu0 %v37_v59 }
  0x10   :  { %v121_v20 = vadd.f32 %v120_v19, %v119_v18 }
  0x12   :  { %v122_v21 = vrot.slane %v121_v20, 2 }
  0x14   :  { %v123_v22 = vadd.f32 %v122_v21, %v121_v20  ;;  %v270_v20 = vld [vmem:[#allocation2] ss:$0 sm:$0xff] }
  0x16   :  { %v124_v23 = vrot.slane %v123_v22, 1 }
  0x18   :  { %v125_v24 = vadd.f32 %v124_v23, %v123_v22 }
  0x1a   :  { %271 = vrsqrt.f32 %v125_v24  ;;  %vm133_vm2 = vcmp.eq.f32.partialorder %v125_v24, inf  ;;  %v136_v32 = vand.u32 2147483648, %v125_v24  ;;  %vm135_vm3 = vcmp.eq.f32.partialorder %v125_v24, 0.0 }
  0x20   :  { %v272_v25 = vpop.eup %271 }
  0x21   :  { %v127_v26 = vmul.f32 %v272_v25, %v125_v24 }
  0x23   :  { %v128_v27 = vmul.f32 %v272_v25, %v127_v26 }
  0x25   :  { %v129_v28 = vmul.f32 0.5, %v128_v27 }
  0x27   :  { %v130_v29 = vsub.f32 1.5, %v129_v28 }
  0x29   :  { %v131_v30 = vmul.f32 %v272_v25, %v130_v29 }
  0x2b   :  { %v132_v31 = vmul.f32 %v131_v30, %v125_v24 }
  0x2d   :  { %v134_v33 = vsel %vm133_vm2, %v125_v24, %v132_v31  ;;  %v31_v24 = vld [vmem:[#allocation2] sm:$0x1] }
  0x2e   :  { %v137_v34 = vsel %vm135_vm3, %v136_v32, %v134_v33 }
  0x2f   :  { %v138_v35 = vmax.f32 %v137_v34, 1e-12 }
  0x31   :  { %273 = vrcp.f32 %v138_v35  ;;  %vm144_vm4 = vweird.f32 %v138_v35  ;;  %v150_v39 = vand.u32 2147483648, %v138_v35  ;;  %v148_v40 = vand.u32 2147483647, %v138_v35 }
  0x33   :  { %v151_v43 = vor.u32 1.1754944e-38, %v150_v39  ;;  %vm149_vm7 = vcmp.eq.f32.partialorder %v148_v40, 8.507059e+37 }
  0x37   :  { %v274_v36 = vpop.eup %273 }
  0x38   :  { %v140_v37 = vmul.f32 %v274_v36, %v138_v35  ;;  %vm145_vm5 = vweird.f32 %v274_v36 }
  0x39   :  { %vm146_vm6 = vmor %vm144_vm4, %vm145_vm5 }
  0x3a   :  { %v141_v38 = vsub.f32 1.0, %v140_v37 }
  0x3c   :  { %v142_v41 = vmul.f32 %v274_v36, %v141_v38 }
  0x3e   :  { %v143_v42 = vadd.f32 %v274_v36, %v142_v41 }
  0x40   :  { %v147_v45 = vsel %vm146_vm6, %v274_v36, %v143_v42 }
  0x41   :  { %v152_v46 = vsel %vm149_vm7, %v151_v43, %v147_v45 }
  0x42   :  { %v156_v47 = vmul.f32 %v152_v46, %v29_v12  ;;  %v155_v48 = vmul.f32 %v152_v46, %v28_v8  ;;  %v154_v49 = vmul.f32 %v152_v46, %v27_v5  ;;  %v153_v51 = vmul.f32 %v152_v46, %v394_v4 }
  0x44   :  { %172 = vmatpush.msra.mxu1 %v156_v47 }
  0x46   :  { %173 = vmatpush.msra.mxu1 %v155_v48 }
  0x48   :  { %174 = vmatpush.msra.mxu1 %v154_v49 }
  0x4a   :  { %175 = vmatpush.msra.mxu1 %v153_v51 }
  0x7a   :  { %v79_v44 = vpop.xlane.xlu0 %78 }
  0x7b   :  { %275 = vrsqrt.f32 %v79_v44  ;;  %vm87_vm9 = vcmp.eq.f32.partialorder %v79_v44, inf  ;;  %v90_v62 = vand.u32 2147483648, %v79_v44  ;;  %vm89_vm10 = vcmp.eq.f32.partialorder %v79_v44, 0.0 }
  0x81   :  { %v276_v50 = vpop.eup %275 }
  0x82   :  { %v81_v52 = vmul.f32 %v276_v50, %v79_v44  ;;  %v39_v21 = vpop.xlane.xlu0 %38 }
  0x83   :  { %v43_v22 = vadd.f32 %v270_v20, %v39_v21 }
  0x84   :  { %v82_v53 = vmul.f32 %v276_v50, %v81_v52 }
  0x85   :  { %208 = vperm.xlu2 %267, %v43_v22   ;;  %73 = vst.msk [vmem:[%s441_s4] sm:$0x3f] %vm72_vm0, %v43_v22  ;;  %s338_s4 = smov [#allocation5]  }
  0x86   :  { %v83_v56 = vmul.f32 0.5, %v82_v53  ;;  %s240_s15 = sshll.u32 %s338_s4, 4  ;;  %s241_s15 = int_to_ptr.vmem [resolvable:$true] %s240_s15 }
  0x88   :  { %v84_v58 = vsub.f32 1.5, %v83_v56 }
  0x8a   :  { %v85_v60 = vmul.f32 %v276_v50, %v84_v58  ;;  %v69_v46 = vpop.f32.mrf.mxu0 }
  0x8c   :  { %v86_v61 = vmul.f32 %v85_v60, %v79_v44 }
  0x8e   :  { %v88_v63 = vsel %vm87_vm9, %v79_v44, %v86_v61 }
  0x8f   :  { %v91_v0 = vsel %vm89_vm10, %v90_v62, %v88_v63 }
  0x90   :  { %v92_v2 = vmax.f32 %v91_v0, 1e-12 }
  0x92   :  { %277 = vrcp.f32 %v92_v2  ;;  %v104_v6 = vand.u32 2147483648, %v92_v2  ;;  %v102_v8 = vand.u32 2147483647, %v92_v2  ;;  %vm98_vm12 = vweird.f32 %v92_v2 }
  0x94   :  { %v105_v10 = vor.u32 1.1754944e-38, %v104_v6  ;;  %vm103_vm14 = vcmp.eq.f32.partialorder %v102_v8, 8.507059e+37 }
  0x98   :  { %v278_v3 = vpop.eup %277 }
  0x99   :  { %v94_v4 = vmul.f32 %v278_v3, %v92_v2  ;;  %vm99_vm11 = vweird.f32 %v278_v3 }
  0x9a   :  { %vm100_vm13 = vmor %vm98_vm12, %vm99_vm11 }
  0x9b   :  { %v95_v5 = vsub.f32 1.0, %v94_v4 }
  0x9d   :  { %v96_v7 = vmul.f32 %v278_v3, %v95_v5 }
  0x9f   :  { %v97_v9 = vadd.f32 %v278_v3, %v96_v7 }
  0xa1   :  { %v101_v11 = vsel %vm100_vm13, %v278_v3, %v97_v9 }
  0xa2   :  { %v106_v12 = vsel %vm103_vm14, %v105_v10, %v101_v11 }
  0xa3   :  { %v107_v13 = vmul.f32 %v106_v12, %v386_v1 }
  0xa5   :  { %261 = vmatmul.msk.f32.vlgmr.msra.gmra.mxu1 %vm49_vm8, %v107_v13 }
  0xdf   :  { %v209_v36 = vpop.permute.xlu2 %208 }
 0x122   :  { %v177_v15 = vpop.f32.mrf.mxu1 }
 0x123   :  { %v180_v16 = vmul.f32 2.0, %v177_v15 }
 0x125   :  { %v262_v17 = vadd.f32 -2.0, %v180_v16 }
 0x127   :  { %v182_v18 = vmin.f32 %v262_v17, 0.0 }
 0x129   :  { %v183_v19 = vmul.f32 1.442695, %v182_v18 }
 0x12b   :  { %279 = vpow2.f32 %v183_v19 }
 0x131   :  { %v280_v23 = vpop.eup %279 }
 0x132   :  { %v186_v1 = vsel %vm185_vm15, %v280_v23, 0.0  ;;  %v197_v32 = vmul.f32 %v280_v23, %v280_v23 }
 0x133   :  { %187 = vadd.xlane.f32.xlu1 %v186_v1  ;;  %v190_v25 = vrot.slane %v186_v1, 4 }
 0x135   :  { %v191_v26 = vadd.f32 %v190_v25, %v186_v1 }
 0x137   :  { %v192_v27 = vrot.slane %v191_v26, 2 }
 0x139   :  { %v193_v28 = vadd.f32 %v192_v27, %v191_v26 }
 0x13b   :  { %v194_v29 = vrot.slane %v193_v28, 1 }
 0x13d   :  { %v195_v30 = vadd.f32 %v194_v29, %v193_v28 }
 0x14c   :  { %45 = vperm.xlu1 %266, %v31_v24  }
 0x1a6   :  { %v188_v31 = vpop.xlane.xlu1 %187 }
 0x1a7   :  { %281 = vrcp.f32 %v188_v31 }
 0x1a8   :  { %283 = vrcp.f32 %v195_v30 }
 0x1ad   :  { %v282_v33 = vpop.eup %281 }
 0x1ae   :  { %v198_v34 = vmul.f32 %v282_v33, %v197_v32  ;;  %v284_v35 = vpop.eup %283 }
 0x1b0   :  { %v199_v37 = vmul.f32 %v284_v35, %v198_v34 }
 0x1b2   :  { %v211_v38 = vmul.f32 %v209_v36, %v199_v37 }
 0x1b4   :  { %v212_v39 = vsel %vm185_vm15, %v211_v38, 0.0 }
 0x1b5   :  { %v213_v40 = vrot.slane %v212_v39, 4 }
 0x1b7   :  { %v214_v41 = vadd.f32 %v213_v40, %v212_v39 }
 0x1b9   :  { %v215_v42 = vrot.slane %v214_v41, 2 }
 0x1bb   :  { %v216_v43 = vadd.f32 %v215_v42, %v214_v41 }
 0x1bd   :  { %v217_v44 = vrot.slane %v216_v43, 1 }
 0x1be   :  { %v46_v45 = vpop.permute.xlu1 %45 }
 0x1bf   :  { %v48_v47 = vperm.slane %v46_v45, 0  ;;  %v218_v48 = vadd.f32 %v217_v44, %v216_v43 }
 0x1c1   :  { %v70_v49 = vadd.f32 %v69_v46, %v48_v47  ;;  %219 = vst.msk [vmem:[#allocation5] sm:$0x1] %vm74_vm1, %v218_v48 }
 0x1c2   :  { %245 = dma.vmem_to_hbm [thread:$0]  %s241_s15, 16, %s243_s18, [#allocation6]  }
 0x1c3   :  { %v200_v50 = vperm.slane %v70_v49, 0  ;;  %75 = vst.msk [vmem:[#allocation3] sm:$0x1] %vm74_vm1, %v70_v49 }
 0x1c4   :  { %232 = dma.vmem_to_hbm [thread:$0]  %s228_s20, 16, %s230_s23, [#allocation4]  }
 0x1c5   :  { %v201_v51 = vmul.f32 %v200_v50, %v199_v37 }
 0x1c7   :  { %v202_v52 = vsel %vm185_vm15, %v201_v51, 0.0 }
 0x1c8   :  { %203 = vadd.xlane.f32.xlu2 %v202_v52 }
 0x23b   :  { %v204_v53 = vpop.xlane.xlu2 %203 }
 0x23c   :  { %205 = vst.msk [vmem:[%s443_s6] sm:$0x3f] %vm72_vm0, %v204_v53 }
 0x23d   :  { %333 = dma.done.wait [#allocation4], 16  }
 0x23e   :  { %334 = vsyncadd [#allocation4], 4294967280 }
 0x23f   :  { %335 = dma.done.wait [#allocation6], 16  }
 0x240   :  { %336 = vsyncadd [#allocation6], 4294967280 }
 0x241   :  { %258 = vsyncpa [#allocation4], 1 }
 0x242   :  { %259 = vsyncpa [#allocation6], 1 }

</bundles_post_ra>
